<compile_context>
chip_gen: v5e
topology: v5e:2x2
jax: 0.10.0
libtpu: 0.0.40
codegen_flags: <defaults>
</compile_context>

<pallas_src>
import functools
import math

import jax
import jax.numpy as jnp
from jax.experimental import pallas as pl
from jax.experimental.pallas import tpu as pltpu


def _round_up(a, m):
    return ((a + m - 1) // m) * m


def _mlp_kernel(x_ref, w1_ref, b1_ref, w2_ref, b2_ref, wh_ref, bh_ref,
                cls_ref, reg_ref, *, num_classes):
    # In-kernel bf16 cast of the x tile (VPU work hidden under the pipeline).
    x = x_ref[...].astype(jnp.bfloat16)
    # fc1 + ReLU   (MXU bf16 matmul -> f32 accumulate; bias-add / relu in f32 on the VPU)
    h1 = jnp.dot(x, w1_ref[...], preferred_element_type=jnp.float32)
    h1 = jnp.maximum(h1 + b1_ref[...], 0.0)
    # fc2 + ReLU
    h2 = jnp.dot(h1.astype(jnp.bfloat16), w2_ref[...], preferred_element_type=jnp.float32)
    h2 = jnp.maximum(h2 + b2_ref[...], 0.0)
    # fused classifier+regressor head: single MXU pass over the lane-padded (64, 128) weight;
    # only the narrow, useful columns are written back to HBM.
    out = jnp.dot(h2.astype(jnp.bfloat16), wh_ref[...], preferred_element_type=jnp.float32)
    out = out + bh_ref[...]
    cls_ref[...] = out[:, :num_classes]
    reg_ref[...] = out[:, num_classes:num_classes + 1]


def prepare_params(params):
    """One-time parameter prep (hoisted out of the per-call forward).

    Casts weights to bf16 and fuses classifier + regressor into one lane-padded head weight
    (padded columns are zero). Returns (prepped_params, num_classes).
    """
    num_classes = params["wc"].shape[1]
    h2_dim = params["w2"].shape[1]
    head_n = _round_up(num_classes + 1, 128)   # lane-dense width for the fused-head matmul
    wh_f32 = (jnp.zeros((h2_dim, head_n), jnp.float32)
              .at[:, :num_classes].set(params["wc"])
              .at[:, num_classes:num_classes + 1].set(params["wr"]))
    bh = (jnp.zeros((1, head_n), jnp.float32)
          .at[:, :num_classes].set(params["bc"])
          .at[:, num_classes:num_classes + 1].set(params["br"]))
    prepped = dict(
        w1=params["w1"].astype(jnp.bfloat16),
        b1=params["b1"].astype(jnp.float32),
        w2=params["w2"].astype(jnp.bfloat16),
        b2=params["b2"].astype(jnp.float32),
        wh=wh_f32.astype(jnp.bfloat16),
        bh=bh,
    )
    return prepped, num_classes


def classifier_regressor_forward(x, prepped, *, num_classes, tm=1024):
    """x: [B, input_dim] float32. Returns (class_output [B, num_classes], reg_output [B, 1])."""
    B, input_dim = x.shape
    h1_dim = prepped["w1"].shape[1]          # 128
    h2_dim = prepped["w2"].shape[1]          # 64
    head_n = prepped["wh"].shape[1]          # 128 (lane-padded fused head)

    # ---- batch tile selection ----
    if B <= 256:
        # Small-B fallback: one tile, rounded to a multiple of 16 (packed-bf16 sublane tile).
        TM = max(16, _round_up(B, 16))
    else:
        # Large tiles amortize per-grid-step overhead; cap so the grid has >= 2 steps so
        # v7x's two TensorCores both get work (no-op on v5e/v6e).
        TM = min(tm, _round_up(pl.cdiv(B, 2), 256))
    B_pad = _round_up(B, TM)
    xp = x if B_pad == B else jnp.pad(x, ((0, B_pad - B), (0, 0)))
    grid = (B_pad // TM,)

    # Conservative scoped-VMEM estimate (v5e default is only 16 MiB).
    vmem_bytes = (
        2 * TM * input_dim * 4                                   # x tile, double-buffered (f32)
        + 2 * TM * (num_classes + 1) * 4                         # narrow outputs, double-buffered
        + 2 * TM * (h1_dim + h2_dim + head_n) * 4                # f32 intermediates (+ slack)
        + 2 * (input_dim * h1_dim + h1_dim * h2_dim + h2_dim * head_n)  # bf16 weights (resident)
        + 4 * (h1_dim + h2_dim + head_n)                         # biases
    )
    vmem_limit = int(min(max(2 * vmem_bytes, 32 * 1024 * 1024), 64 * 1024 * 1024))

    cls_pad, reg_pad = pl.pallas_call(
        functools.partial(_mlp_kernel, num_classes=num_classes),
        out_shape=(jax.ShapeDtypeStruct((B_pad, num_classes), jnp.float32),
                   jax.ShapeDtypeStruct((B_pad, 1), jnp.float32)),
        grid=grid,
        in_specs=[
            pl.BlockSpec((TM, input_dim), lambda i: (i, 0)),      # x tile: streamed / pipelined
            pl.BlockSpec((input_dim, h1_dim), lambda i: (0, 0)),  # w1: VMEM-resident
            pl.BlockSpec((1, h1_dim), lambda i: (0, 0)),          # b1: resident
            pl.BlockSpec((h1_dim, h2_dim), lambda i: (0, 0)),     # w2: resident
            pl.BlockSpec((1, h2_dim), lambda i: (0, 0)),          # b2: resident
            pl.BlockSpec((h2_dim, head_n), lambda i: (0, 0)),     # fused head weight: resident
            pl.BlockSpec((1, head_n), lambda i: (0, 0)),          # fused head bias: resident
        ],
        out_specs=(pl.BlockSpec((TM, num_classes), lambda i: (i, 0)),
                   pl.BlockSpec((TM, 1), lambda i: (i, 0))),
        compiler_params=pltpu.CompilerParams(
            dimension_semantics=("parallel",),   # v7x: shard batch axis over 2 TensorCores
            vmem_limit_bytes=vmem_limit,
        ),
    )(xp, prepped["w1"], prepped["b1"], prepped["w2"], prepped["b2"],
      prepped["wh"], prepped["bh"])

    if B_pad != B:
        cls_pad = cls_pad[:B]
        reg_pad = reg_pad[:B]
    return cls_pad, reg_pad


def init_params(key, input_dim, num_classes):
    """Deterministic init mimicking nn.Linear default (uniform(-1/sqrt(fan_in), 1/sqrt(fan_in)))."""
    def linear(key, fan_in, fan_out):
        kw, kb = jax.random.split(key)
        bound = 1.0 / math.sqrt(fan_in)
        w = jax.random.uniform(kw, (fan_in, fan_out), jnp.float32, -bound, bound)
        b = jax.random.uniform(kb, (1, fan_out), jnp.float32, -bound, bound)
        return w, b

    k1, k2, k3, k4 = jax.random.split(key, 4)
    w1, b1 = linear(k1, input_dim, 128)
    w2, b2 = linear(k2, 128, 64)
    wc, bc = linear(k3, 64, num_classes)
    wr, br = linear(k4, 64, 1)
    return dict(w1=w1, b1=b1, w2=w2, b2=b2, wc=wc, bc=bc, wr=wr, br=br)


def reference_forward(x, p):
    h1 = jnp.maximum(x @ p["w1"] + p["b1"], 0.0)
    h2 = jnp.maximum(h1 @ p["w2"] + p["b2"], 0.0)
    return h2 @ p["wc"] + p["bc"], h2 @ p["wr"] + p["br"]


if __name__ == "__main__":
    input_dim = 16
    num_classes = 4
    batch = 8

    key = jax.random.PRNGKey(0)
    kx, kp = jax.random.split(key)
    x = jax.random.normal(kx, (batch, input_dim), jnp.float32)
    params = init_params(kp, input_dim, num_classes)

    # One-time parameter prep (bf16 cast + head fusion), outside the per-call forward.
    prepped, n_cls = prepare_params(params)
    prepped = jax.block_until_ready(prepped)

    fwd = jax.jit(classifier_regressor_forward, static_argnames=("num_classes", "tm"))
    cls_out, reg_out = fwd(x, prepped, num_classes=n_cls)
    jax.block_until_ready((cls_out, reg_out))

    cls_ref, reg_ref = reference_forward(x, params)
    assert cls_out.shape == (batch, num_classes)
    assert reg_out.shape == (batch, 1)
    # bf16 weights/activations with f32 accumulation -> ~1e-2 relative error vs f32 reference.
    assert jnp.allclose(cls_out, cls_ref, atol=5e-2, rtol=5e-2)
    assert jnp.allclose(reg_out, reg_ref, atol=5e-2, rtol=5e-2)

    print("KERNEL_OK")
</pallas_src>

<mosaic_0001>
module attributes {stable_mosaic.version = 11 : i64} {
  func.func @_mlp_kernel(%arg0: i32, %arg1: memref<16x16xf32, #tpu.memory_space<vmem>>, %arg2: memref<16x128xbf16, #tpu.memory_space<vmem>>, %arg3: memref<1x128xf32, #tpu.memory_space<vmem>>, %arg4: memref<128x64xbf16, #tpu.memory_space<vmem>>, %arg5: memref<1x64xf32, #tpu.memory_space<vmem>>, %arg6: memref<64x128xbf16, #tpu.memory_space<vmem>>, %arg7: memref<1x128xf32, #tpu.memory_space<vmem>>, %arg8: memref<16x4xf32, #tpu.memory_space<vmem>>, %arg9: memref<16x1xf32, #tpu.memory_space<vmem>>) attributes {dimension_semantics = [#tpu.dimension_semantics<parallel>], iteration_bounds = array<i64: 1>, scalar_prefetch = 0 : i64, scratch_operands = 0 : i64, tpu.core_type = #tpu.core_type<tc>, window_params = [{transform_indices = @transform_0, window_bounds = array<i64: 16, 16>}, {pipeline_mode = #tpu.pipeline_mode<synchronous>, transform_indices = @transform_1, window_bounds = array<i64: 16, 128>}, {pipeline_mode = #tpu.pipeline_mode<synchronous>, transform_indices = @transform_2, window_bounds = array<i64: 1, 128>}, {pipeline_mode = #tpu.pipeline_mode<synchronous>, transform_indices = @transform_3, window_bounds = array<i64: 128, 64>}, {pipeline_mode = #tpu.pipeline_mode<synchronous>, transform_indices = @transform_4, window_bounds = array<i64: 1, 64>}, {pipeline_mode = #tpu.pipeline_mode<synchronous>, transform_indices = @transform_5, window_bounds = array<i64: 64, 128>}, {pipeline_mode = #tpu.pipeline_mode<synchronous>, transform_indices = @transform_6, window_bounds = array<i64: 1, 128>}, {transform_indices = @transform_7, window_bounds = array<i64: 16, 4>}, {transform_indices = @transform_8, window_bounds = array<i64: 16, 1>}]} {
    %c0 = arith.constant 0 : index
    %c0_0 = arith.constant 0 : index
    %0 = vector.load %arg1[%c0, %c0_0] : memref<16x16xf32, #tpu.memory_space<vmem>>, vector<16x16xf32>
    %1 = arith.truncf %0 : vector<16x16xf32> to vector<16x16xbf16>
    %c0_1 = arith.constant 0 : index
    %c0_2 = arith.constant 0 : index
    %2 = vector.load %arg2[%c0_1, %c0_2] : memref<16x128xbf16, #tpu.memory_space<vmem>>, vector<16x128xbf16>
    %cst = arith.constant dense<0.000000e+00> : vector<16x128xf32>
    %3 = tpu.matmul %1, %2, %cst {dimension_numbers = #tpu.dot_dimension_numbers<[1], [0], [0], [1], [0, 0, 1, 1], [], []>} : vector<16x16xbf16>, vector<16x128xbf16>, vector<16x128xf32> -> vector<16x128xf32>
    %c0_3 = arith.constant 0 : index
    %c0_4 = arith.constant 0 : index
    %4 = vector.load %arg3[%c0_3, %c0_4] : memref<1x128xf32, #tpu.memory_space<vmem>>, vector<1x128xf32>
    %5 = vector.broadcast %4 : vector<1x128xf32> to vector<16x128xf32>
    %6 = arith.addf %3, %5 : vector<16x128xf32>
    %cst_5 = arith.constant 0.000000e+00 : f32
    %7 = vector.broadcast %cst_5 : f32 to vector<16x128xf32>
    %8 = arith.maximumf %6, %7 : vector<16x128xf32>
    %9 = arith.truncf %8 : vector<16x128xf32> to vector<16x128xbf16>
    %c0_6 = arith.constant 0 : index
    %c0_7 = arith.constant 0 : index
    %10 = vector.load %arg4[%c0_6, %c0_7] : memref<128x64xbf16, #tpu.memory_space<vmem>>, vector<128x64xbf16>
    %cst_8 = arith.constant dense<0.000000e+00> : vector<16x64xf32>
    %11 = tpu.matmul %9, %10, %cst_8 {dimension_numbers = #tpu.dot_dimension_numbers<[1], [0], [0], [1], [0, 0, 1, 1], [], []>} : vector<16x128xbf16>, vector<128x64xbf16>, vector<16x64xf32> -> vector<16x64xf32>
    %c0_9 = arith.constant 0 : index
    %c0_10 = arith.constant 0 : index
    %12 = vector.load %arg5[%c0_9, %c0_10] : memref<1x64xf32, #tpu.memory_space<vmem>>, vector<1x64xf32>
    %13 = vector.broadcast %12 : vector<1x64xf32> to vector<16x64xf32>
    %14 = arith.addf %11, %13 : vector<16x64xf32>
    %cst_11 = arith.constant 0.000000e+00 : f32
    %15 = vector.broadcast %cst_11 : f32 to vector<16x64xf32>
    %16 = arith.maximumf %14, %15 : vector<16x64xf32>
    %17 = arith.truncf %16 : vector<16x64xf32> to vector<16x64xbf16>
    %c0_12 = arith.constant 0 : index
    %c0_13 = arith.constant 0 : index
    %18 = vector.load %arg6[%c0_12, %c0_13] : memref<64x128xbf16, #tpu.memory_space<vmem>>, vector<64x128xbf16>
    %cst_14 = arith.constant dense<0.000000e+00> : vector<16x128xf32>
    %19 = tpu.matmul %17, %18, %cst_14 {dimension_numbers = #tpu.dot_dimension_numbers<[1], [0], [0], [1], [0, 0, 1, 1], [], []>} : vector<16x64xbf16>, vector<64x128xbf16>, vector<16x128xf32> -> vector<16x128xf32>
    %c0_15 = arith.constant 0 : index
    %c0_16 = arith.constant 0 : index
    %20 = vector.load %arg7[%c0_15, %c0_16] : memref<1x128xf32, #tpu.memory_space<vmem>>, vector<1x128xf32>
    %21 = vector.broadcast %20 : vector<1x128xf32> to vector<16x128xf32>
    %22 = arith.addf %19, %21 : vector<16x128xf32>
    %23 = vector.extract_strided_slice %22 {offsets = [0, 0], sizes = [16, 4], strides = [1, 1]} : vector<16x128xf32> to vector<16x4xf32>
    %c0_17 = arith.constant 0 : index
    %c0_18 = arith.constant 0 : index
    %24 = vector.load %arg8[%c0_17, %c0_18] : memref<16x4xf32, #tpu.memory_space<vmem>>, vector<16x4xf32>
    tpu.vector_store %arg8[%c0_17, %c0_18], %23 {strides = array<i32>} : memref<16x4xf32, #tpu.memory_space<vmem>>, vector<16x4xf32>,
    %25 = vector.extract_strided_slice %22 {offsets = [0, 4], sizes = [16, 1], strides = [1, 1]} : vector<16x128xf32> to vector<16x1xf32>
    %c0_19 = arith.constant 0 : index
    %c0_20 = arith.constant 0 : index
    %26 = vector.load %arg9[%c0_19, %c0_20] : memref<16x1xf32, #tpu.memory_space<vmem>>, vector<16x1xf32>
    tpu.vector_store %arg9[%c0_19, %c0_20], %25 {strides = array<i32>} : memref<16x1xf32, #tpu.memory_space<vmem>>, vector<16x1xf32>,
    return
  }
  func.func @transform_0(%arg0: i32) -> (i32, i32) {
    %c0_i32 = arith.constant 0 : i32
    %c0_i32_0 = arith.constant 0 : i32
    return %arg0, %c0_i32 : i32, i32
  }
  func.func @transform_1(%arg0: i32) -> (i32, i32) {
    %c0_i32 = arith.constant 0 : i32
    %c0_i32_0 = arith.constant 0 : i32
    %c0_i32_1 = arith.constant 0 : i32
    return %c0_i32, %c0_i32_0 : i32, i32
  }
  func.func @transform_2(%arg0: i32) -> (i32, i32) {
    %c0_i32 = arith.constant 0 : i32
    %c0_i32_0 = arith.constant 0 : i32
    %c0_i32_1 = arith.constant 0 : i32
    return %c0_i32, %c0_i32_0 : i32, i32
  }
  func.func @transform_3(%arg0: i32) -> (i32, i32) {
    %c0_i32 = arith.constant 0 : i32
    %c0_i32_0 = arith.constant 0 : i32
    %c0_i32_1 = arith.constant 0 : i32
    return %c0_i32, %c0_i32_0 : i32, i32
  }
  func.func @transform_4(%arg0: i32) -> (i32, i32) {
    %c0_i32 = arith.constant 0 : i32
    %c0_i32_0 = arith.constant 0 : i32
    %c0_i32_1 = arith.constant 0 : i32
    return %c0_i32, %c0_i32_0 : i32, i32
  }
  func.func @transform_5(%arg0: i32) -> (i32, i32) {
    %c0_i32 = arith.constant 0 : i32
    %c0_i32_0 = arith.constant 0 : i32
    %c0_i32_1 = arith.constant 0 : i32
    return %c0_i32, %c0_i32_0 : i32, i32
  }
  func.func @transform_6(%arg0: i32) -> (i32, i32) {
    %c0_i32 = arith.constant 0 : i32
    %c0_i32_0 = arith.constant 0 : i32
    %c0_i32_1 = arith.constant 0 : i32
    return %c0_i32, %c0_i32_0 : i32, i32
  }
  func.func @transform_7(%arg0: i32) -> (i32, i32) {
    %c0_i32 = arith.constant 0 : i32
    %c0_i32_0 = arith.constant 0 : i32
    return %arg0, %c0_i32 : i32, i32
  }
  func.func @transform_8(%arg0: i32) -> (i32, i32) {
    %c0_i32 = arith.constant 0 : i32
    %c0_i32_0 = arith.constant 0 : i32
    return %arg0, %c0_i32 : i32, i32
  }
}

</mosaic_0001>

<bundles_post_ra>
// kernel: classifier_regressor_forward.1
= control target key start
LH: loop header
LB: loop body
LE: loop exit
PB: predicated region body
PF: predicated region fallthrough
CT: control target
= control target key end

     0   :  { %vm44_vm0 = vcmask 130048   ;;  %vm186_vm1 = vcmask 523264   ;;  %vm204_vm2 = vcmask 31744   ;;  %vm215_vm3 = vcmask 7168   ;;  %s409_s1 = inlined_call_operand.vmem [shape: bf16[16,128], index: 1, kind: input, shape index: {}]   ;;  %s410_s0 = inlined_call_operand.vmem [shape: f32[16,16], index: 0, kind: input, shape index: {}]   ;;  %s411_s3 = inlined_call_operand.vmem [shape: bf16[128,64], index: 3, kind: input, shape index: {}]   ;;  %s412_s2 = inlined_call_operand.vmem [shape: f32[1,128], index: 2, kind: input, shape index: {}]   ;;  %s413_s4 = inlined_call_operand.vmem [shape: f32[1,64], index: 4, kind: input, shape index: {}]   ;;  %s414_s6 = inlined_call_operand.vmem [shape: f32[1,128], index: 6, kind: input, shape index: {}]   ;;  %s415_s5 = inlined_call_operand.vmem [shape: bf16[64,128], index: 5, kind: input, shape index: {}]   ;;  %s416_s7 = inlined_call_operand.vmem [shape: f32[16,4], index: 7, kind: output, shape index: {0}]   ;;  %s417_s8 = inlined_call_operand.vmem [shape: f32[16,1], index: 8, kind: output, shape index: {1}]  }
   0x1   :  { %v280_v0 = vld [vmem:[%s409_s1] sm:$0xff]  ;;  %v30_v2 = vld [vmem:[%s410_s0 + $0x8] sm:$0xff]  ;;  %v288_v4 = vld [vmem:[%s411_s3 + $0x38] sm:$0xff] }
   0x2   :  { %v29_v1 = vld [vmem:[%s410_s0] sm:$0xff]  ;;  %55 = vmatpush.bf16.msra.mxu0 %v280_v0  ;;  %133 = vmatpush.bf16.msra.mxu1 %v288_v4  ;;  %v287_v5 = vld [vmem:[%s411_s3 + $0x30] sm:$0xff]  ;;  %v286_v6 = vld [vmem:[%s411_s3 + $0x28] sm:$0xff] }
   0x3   :  { %v31_v3 = vpack.c.bf16 %v30_v2, %v29_v1  ;;  %v285_v7 = vld [vmem:[%s411_s3 + $0x20] sm:$0xff]  ;;  %v284_v8 = vld [vmem:[%s411_s3 + $0x18] sm:$0xff]  ;;  %v283_v9 = vld [vmem:[%s411_s3 + $0x10] sm:$0xff] }
   0x4   :  { %v282_v10 = vld [vmem:[%s411_s3 + $0x8] sm:$0xff]  ;;  %v281_v11 = vld [vmem:[%s411_s3] sm:$0xff]  ;;  %v292_v20 = vld [vmem:[%s415_s5 + $0x18] sm:$0xff] }
   0x5   :  { %230 = vmatmul.msk.bf16.vlgmr.msra.gmra.mxu0 %vm44_vm0, %v31_v3  ;;  %v294_v13 = vld [vmem:[%s412_s2] ss:$0 sm:$0xff]  ;;  %194 = vmatpush.bf16.msra.mxu2 %v292_v20  ;;  %v291_v21 = vld [vmem:[%s415_s5 + $0x10] sm:$0xff]  ;;  %v290_v22 = vld [vmem:[%s415_s5 + $0x8] sm:$0xff] }
   0x6   :  { %134 = vmatpush.bf16.msra.mxu1 %v287_v5  ;;  %v289_v23 = vld [vmem:[%s415_s5] sm:$0xff] }
   0x7   :  { %v295_v25 = vld [vmem:[%s413_s4] ss:$0 sm:$0xff]  ;;  %s297_s4 = smov 124  }
   0x8   :  { %v296_v32 = vld [vmem:[%s414_s6] ss:$0 sm:$0xff] }
   0x9   :  { %195 = vmatpush.bf16.msra.mxu2 %v291_v21 }
   0xa   :  { %135 = vmatpush.bf16.msra.mxu1 %v286_v6 }
   0xd   :  { %196 = vmatpush.bf16.msra.mxu2 %v290_v22 }
   0xe   :  { %136 = vmatpush.bf16.msra.mxu1 %v285_v7 }
  0x11   :  { %197 = vmatpush.bf16.msra.mxu2 %v289_v23 }
  0x12   :  { %137 = vmatpush.bf16.msra.mxu1 %v284_v8 }
  0x16   :  { %138 = vmatpush.bf16.msra.mxu1 %v283_v9 }
  0x1a   :  { %139 = vmatpush.bf16.msra.mxu1 %v282_v10 }
  0x1e   :  { %140 = vmatpush.bf16.msra.mxu1 %v281_v11 }
  0x82   :  { %v57_v12 = vpop.f32.mrf.mxu0 }
  0x83   :  { %v58_v14 = vadd.f32 %v294_v13, %v57_v12 }
  0x85   :  { %v62_v17 = vmax.f32 %v58_v14, 0.0 }
  0x8a   :  { %v59_v15 = vpop.f32.mrf.mxu0 }
  0x8b   :  { %v60_v16 = vadd.f32 %v294_v13, %v59_v15 }
  0x8d   :  { %v63_v18 = vmax.f32 %v60_v16, 0.0 }
  0x8f   :  { %v64_v19 = vpack.c.bf16 %v63_v18, %v62_v17 }
  0x91   :  { %141 = vmatmul.bf16.vlgmr.msra.gmra.mxu1 %v64_v19 }
 0x10e   :  { %v142_v24 = vpop.f32.mrf.mxu1 }
 0x10f   :  { %v143_v26 = vadd.f32 %v295_v25, %v142_v24 }
 0x111   :  { %v147_v29 = vmax.f32 %v143_v26, 0.0 }
 0x116   :  { %v144_v27 = vpop.f32.mrf.mxu1 }
 0x117   :  { %v145_v28 = vadd.f32 %v295_v25, %v144_v27 }
 0x119   :  { %v148_v30 = vmax.f32 %v145_v28, 0.0 }
 0x11b   :  { %v149_v31 = vpack.c.bf16 %v148_v30, %v147_v29 }
 0x11d   :  { %279 = vmatmul.msk.bf16.vlgmr.msra.gmra.mxu2 %vm186_vm1, %v149_v31 }
 0x1a0   :  { %v199_v33 = vpop.f32.mrf.mxu2 }
 0x1a1   :  { %v200_v34 = vadd.f32 %v296_v32, %v199_v33 }
 0x1a3   :  { %205 = vst.msk [vmem:[%s416_s7] sm:$0xff] %vm204_vm2, %v200_v34  ;;  %209 = vrot.lane.b32.xlu0 %v200_v34, %s297_s4 }
 0x1a8   :  { %v201_v35 = vpop.f32.mrf.mxu2 }
 0x1a9   :  { %v202_v36 = vadd.f32 %v296_v32, %v201_v35 }
 0x1ab   :  { %206 = vst.msk [vmem:[%s416_s7 + $0x8] sm:$0xff] %vm204_vm2, %v202_v36  ;;  %211 = vrot.lane.b32.xlu0 %v202_v36, %s297_s4 }
 0x215   :  { %v210_v37 = vpop.permute.xlu0 %209 }
 0x216   :  { %216 = vst.msk [vmem:[%s417_s8] sm:$0xff] %vm215_vm3, %v210_v37 }
 0x21d   :  { %v212_v38 = vpop.permute.xlu0 %211 }
 0x21e   :  { %217 = vst.msk [vmem:[%s417_s8 + $0x8] sm:$0xff] %vm215_vm3, %v212_v38 }

</bundles_post_ra>
